<compile_context>
chip_gen: v6e
topology: v6e:2x2x1
jax: 0.10.0
libtpu: 0.0.40
codegen_flags: <defaults>
</compile_context>

<pallas_src>
import functools

import jax
import jax.numpy as jnp
from jax.experimental import pallas as pl
from jax.experimental.pallas import tpu as pltpu


_LANE_CANDIDATES = (2048, 1024, 512, 256, 128)   # preferred lane-dense widths
_MIN_PALLAS_ELEMS = 1 << 16   # below ~256 KiB (f32) a fused XLA op is faster


@functools.lru_cache(maxsize=None)
def _vmem_plan_bytes():
    """Return (double-buffered I/O byte budget, vmem_limit_bytes) per chip gen."""
    try:
        cap = int(pltpu.get_tpu_info().vmem_capacity_bytes)
    except Exception:
        cap = 64 << 20                      # assume the smallest VMEM (v7x-like)
    if cap >= (128 << 20):                  # v5e / v6e: 128 MiB physical VMEM
        return 64 << 20, 96 << 20
    return 32 << 20, 48 << 20               # v7x: 64 MiB physical VMEM


def _out_dtype(dtype):
    # Match PyTorch promotion: float stays in its dtype, ints promote to f32.
    return dtype if jnp.issubdtype(dtype, jnp.floating) else jnp.float32


def _jnp_denorm(x, iqr, median, out_dtype):
    return (x.astype(jnp.float32) * iqr + median).astype(out_dtype)


# --------------------------------------------------------------------------
# Kernels: FMA in f32 on the VPU, scale/shift read from SMEM.
# --------------------------------------------------------------------------
def _denorm1_kernel(params_ref, x_ref, o_ref):
    scale = params_ref[0]
    shift = params_ref[1]
    o_ref[...] = (x_ref[...].astype(jnp.float32) * scale + shift).astype(o_ref.dtype)


def _denorm2_kernel(params_ref, x_ref, y_ref, ox_ref, oy_ref):
    scale = params_ref[0]
    shift = params_ref[1]
    ox_ref[...] = (x_ref[...].astype(jnp.float32) * scale + shift).astype(ox_ref.dtype)
    oy_ref[...] = (y_ref[...].astype(jnp.float32) * scale + shift).astype(oy_ref.dtype)


# --------------------------------------------------------------------------
# Layout / tiling plan.
# --------------------------------------------------------------------------
def _plan(n, max_itemsize, min_itemsize, n_io_arrays):
    """Pick a lane-dense 2-D view (free reshape), block shape, grid, index_map.

    Ragged last blocks are masked by Pallas, so no jnp.pad / trailing slice
    (and therefore no extra HBM passes) is ever needed.
    """
    io_budget, _ = _vmem_plan_bytes()
    # Total resident VMEM ~= 2 buffers * n_io_arrays * block_bytes.
    block_bytes = max(128 * 1024, io_budget // (2 * n_io_arrays))
    block_elems = max(1024, block_bytes // max_itemsize)
    # Sublane granule including sub-32-bit packing (f32:8, bf16:16, int8:32).
    granule = max(8, 32 // max(1, min_itemsize))

    for cols in _LANE_CANDIDATES:
        if n % cols == 0:
            rows = n // cols
            if rows <= granule:
                return (rows, cols), (rows, cols), 1, (lambda i: (0, 0))
            br = max(granule, (block_elems // cols) // granule * granule)
            # Guarantee >= 2 grid steps so both v7x TensorCores get work.
            half = max(granule, -(-((rows + 1) // 2) // granule) * granule)
            br = min(br, half)
            return (rows, cols), (br, cols), pl.cdiv(rows, br), (lambda i: (i, 0))

    # Non-128-divisible size: (1, n) view, blocks along the lane dim (multiple
    # of 1024 = 8x128).  The sublane dim pads 1->8 in VMEM, so budget lanes at
    # block_bytes / 8.  The ragged last block is masked by Pallas.
    blk = max(1024, (block_bytes // (8 * max_itemsize)) // 1024 * 1024)
    half = -(-((n + 1) // 2) // 1024) * 1024
    blk = min(blk, half)
    return (1, n), (1, blk), pl.cdiv(n, blk), (lambda i: (0, i))


def _compiler_params():
    _, vmem_limit = _vmem_plan_bytes()
    return pltpu.CompilerParams(
        dimension_semantics=("parallel",),
        vmem_limit_bytes=vmem_limit,
    )


# --------------------------------------------------------------------------
# Wrappers.
# --------------------------------------------------------------------------
def pallas_denorm(x, iqr, median):
    """Elementwise x * IQR + Median via a Pallas TPU kernel (any rank/dtype)."""
    out_dtype = _out_dtype(x.dtype)
    n = x.size
    if n < _MIN_PALLAS_ELEMS:
        return _jnp_denorm(x, iqr, median, out_dtype)

    in_isz = jnp.dtype(x.dtype).itemsize
    out_isz = jnp.dtype(out_dtype).itemsize
    view_shape, block, grid, idx = _plan(
        n, max(in_isz, out_isz), min(in_isz, out_isz), n_io_arrays=2)

    spec = pl.BlockSpec(block, idx)
    params = jnp.asarray([iqr, median], dtype=jnp.float32)

    out = pl.pallas_call(
        _denorm1_kernel,
        out_shape=jax.ShapeDtypeStruct(view_shape, out_dtype),
        grid=(grid,),
        in_specs=[pl.BlockSpec(memory_space=pltpu.MemorySpace.SMEM), spec],
        out_specs=spec,
        compiler_params=_compiler_params(),
    )(params, x.reshape(view_shape))
    return out.reshape(x.shape)


def pallas_denorm_pair(x, y, iqr, median):
    """Denormalize two same-shape/same-dtype tensors in ONE kernel launch."""
    assert x.shape == y.shape and x.dtype == y.dtype
    out_dtype = _out_dtype(x.dtype)
    n = x.size
    if n < _MIN_PALLAS_ELEMS:
        return (_jnp_denorm(x, iqr, median, out_dtype),
                _jnp_denorm(y, iqr, median, out_dtype))

    in_isz = jnp.dtype(x.dtype).itemsize
    out_isz = jnp.dtype(out_dtype).itemsize
    view_shape, block, grid, idx = _plan(
        n, max(in_isz, out_isz), min(in_isz, out_isz), n_io_arrays=4)

    spec = pl.BlockSpec(block, idx)
    params = jnp.asarray([iqr, median], dtype=jnp.float32)

    ox, oy = pl.pallas_call(
        _denorm2_kernel,
        out_shape=(jax.ShapeDtypeStruct(view_shape, out_dtype),
                   jax.ShapeDtypeStruct(view_shape, out_dtype)),
        grid=(grid,),
        in_specs=[pl.BlockSpec(memory_space=pltpu.MemorySpace.SMEM), spec, spec],
        out_specs=(spec, spec),
        compiler_params=_compiler_params(),
    )(params, x.reshape(view_shape), y.reshape(view_shape))
    return ox.reshape(x.shape), oy.reshape(y.shape)


class Denormalize:
    """JAX/Pallas port of the PyTorch Denormalize module."""

    def __init__(self, scaler_dict):
        self.scaler_dict = scaler_dict

    def denorm(self, x, tk):
        s = self.scaler_dict[tk]
        return pallas_denorm(x, s["IQR"], s["Median"])

    def forward(self, o, t, output_dims):
        o_denorm, t_denorm = {}, {}
        for tk in o.keys():
            if output_dims[tk] == 1:
                s = self.scaler_dict[tk]
                ot, tt = o[tk], t[tk]
                if ot.shape == tt.shape and ot.dtype == tt.dtype:
                    # One launch, two in / two out refs: this op is pure HBM
                    # bandwidth, so avoid any stack/gather copies.
                    o_denorm[tk], t_denorm[tk] = pallas_denorm_pair(
                        ot, tt, s["IQR"], s["Median"])
                else:
                    o_denorm[tk] = pallas_denorm(ot, s["IQR"], s["Median"])
                    t_denorm[tk] = pallas_denorm(tt, s["IQR"], s["Median"])
            else:
                o_denorm[tk] = o[tk]
                t_denorm[tk] = t[tk]
        return o_denorm, t_denorm

    __call__ = forward


if __name__ == "__main__":
    key = jax.random.PRNGKey(0)
    keys = jax.random.split(key, 12)

    # Deterministic synthetic "scaler" parameters (no checkpoint load).
    scaler_dict = {
        "temperature": {"Median": 15.0, "IQR": 7.5},
        "pressure":    {"Median": 1013.0, "IQR": 25.0},
        "humidity":    {"Median": 50.0, "IQR": 5.0},
        "rain":        {"Median": 1.0, "IQR": 0.5},
        "dewpoint":    {"Median": 10.0, "IQR": 4.0},
        "wind":        {"Median": 3.0, "IQR": 2.0},
    }
    output_dims = {"temperature": 1, "pressure": 1, "humidity": 1,
                   "rain": 1, "dewpoint": 1, "wind": 2}

    # Shapes cover every code path:
    #  * temperature/pressure: 128-divisible -> fused 2-in/2-out 2-D path
    #  * humidity: o bf16 vs t f32 -> two single launches (bf16 + f32)
    #  * rain: ragged 1-D length -> (1, n) lane-blocked masked path
    #  * dewpoint: small -> plain-jnp fallback
    #  * wind: output_dims == 2 -> pass-through
    o = {
        "temperature": jax.random.normal(keys[0], (2, 4, 128, 128), jnp.float32),
        "pressure":    jax.random.normal(keys[1], (2, 4, 128, 128), jnp.bfloat16),
        "humidity":    jax.random.normal(keys[2], (2, 4, 128, 128), jnp.bfloat16),
        "rain":        jax.random.normal(keys[3], (70001,), jnp.float32),
        "dewpoint":    jax.random.normal(keys[4], (2, 3, 16, 16), jnp.float32),
        "wind":        jax.random.normal(keys[5], (2, 2, 16, 16), jnp.float32),
    }
    t = {
        "temperature": jax.random.normal(keys[6], (2, 4, 128, 128), jnp.float32),
        "pressure":    jax.random.normal(keys[7], (2, 4, 128, 128), jnp.bfloat16),
        "humidity":    jax.random.normal(keys[8], (2, 4, 128, 128), jnp.float32),
        "rain":        jax.random.normal(keys[9], (70001,), jnp.float32),
        "dewpoint":    jax.random.normal(keys[10], (2, 3, 16, 16), jnp.float32),
        "wind":        jax.random.normal(keys[11], (2, 2, 16, 16), jnp.float32),
    }

    model = Denormalize(scaler_dict)
    o_denorm, t_denorm = model(o, t, output_dims)

    # Block on all outputs and verify against a plain-JAX reference.
    for d_in, d_out in ((o, o_denorm), (t, t_denorm)):
        for tk in d_in:
            y = jax.block_until_ready(d_out[tk])
            assert y.shape == d_in[tk].shape, tk
            if output_dims[tk] == 1:
                iqr = scaler_dict[tk]["IQR"]
                med = scaler_dict[tk]["Median"]
                ref = (d_in[tk].astype(jnp.float32) * iqr + med).astype(y.dtype)
            else:
                ref = d_in[tk]
            atol, rtol = (5e-1, 2e-2) if y.dtype == jnp.bfloat16 else (1e-5, 1e-5)
            assert jnp.allclose(y.astype(jnp.float32), ref.astype(jnp.float32),
                                atol=atol, rtol=rtol), tk

    print("KERNEL_OK")
</pallas_src>

<mosaic_0001>
module attributes {stable_mosaic.version = 11 : i64} {
  func.func @_denorm2_kernel(%arg0: i32, %arg1: memref<2xf32, #tpu.memory_space<smem>>, %arg2: memref<32x2048xf32, #tpu.memory_space<vmem>>, %arg3: memref<32x2048xf32, #tpu.memory_space<vmem>>, %arg4: memref<32x2048xf32, #tpu.memory_space<vmem>>, %arg5: memref<32x2048xf32, #tpu.memory_space<vmem>>) attributes {dimension_semantics = [#tpu.dimension_semantics<parallel>], iteration_bounds = array<i64: 2>, scalar_prefetch = 0 : i64, scratch_operands = 0 : i64, tpu.core_type = #tpu.core_type<tc>, window_params = [{transform_indices = @transform_0, window_bounds = array<i64: 2>}, {transform_indices = @transform_1, window_bounds = array<i64: 32, 2048>}, {transform_indices = @transform_2, window_bounds = array<i64: 32, 2048>}, {transform_indices = @transform_3, window_bounds = array<i64: 32, 2048>}, {transform_indices = @transform_4, window_bounds = array<i64: 32, 2048>}]} {
    %c0 = arith.constant 0 : index
    %0 = memref.load %arg1[%c0] : memref<2xf32, #tpu.memory_space<smem>>
    %c1 = arith.constant 1 : index
    %1 = memref.load %arg1[%c1] : memref<2xf32, #tpu.memory_space<smem>>
    %c0_0 = arith.constant 0 : index
    %c0_1 = arith.constant 0 : index
    %2 = vector.load %arg2[%c0_0, %c0_1] : memref<32x2048xf32, #tpu.memory_space<vmem>>, vector<32x2048xf32>
    %3 = vector.broadcast %0 : f32 to vector<32x2048xf32>
    %4 = arith.mulf %2, %3 : vector<32x2048xf32>
    %5 = vector.broadcast %1 : f32 to vector<32x2048xf32>
    %6 = arith.addf %4, %5 : vector<32x2048xf32>
    %c0_2 = arith.constant 0 : index
    %c0_3 = arith.constant 0 : index
    %7 = vector.load %arg4[%c0_2, %c0_3] : memref<32x2048xf32, #tpu.memory_space<vmem>>, vector<32x2048xf32>
    tpu.vector_store %arg4[%c0_2, %c0_3], %6 {strides = array<i32>} : memref<32x2048xf32, #tpu.memory_space<vmem>>, vector<32x2048xf32>,
    %c0_4 = arith.constant 0 : index
    %c0_5 = arith.constant 0 : index
    %8 = vector.load %arg3[%c0_4, %c0_5] : memref<32x2048xf32, #tpu.memory_space<vmem>>, vector<32x2048xf32>
    %9 = vector.broadcast %0 : f32 to vector<32x2048xf32>
    %10 = arith.mulf %8, %9 : vector<32x2048xf32>
    %11 = vector.broadcast %1 : f32 to vector<32x2048xf32>
    %12 = arith.addf %10, %11 : vector<32x2048xf32>
    %c0_6 = arith.constant 0 : index
    %c0_7 = arith.constant 0 : index
    %13 = vector.load %arg5[%c0_6, %c0_7] : memref<32x2048xf32, #tpu.memory_space<vmem>>, vector<32x2048xf32>
    tpu.vector_store %arg5[%c0_6, %c0_7], %12 {strides = array<i32>} : memref<32x2048xf32, #tpu.memory_space<vmem>>, vector<32x2048xf32>,
    return
  }
  func.func @transform_0(%arg0: i32) -> i32 {
    %c0_i32 = arith.constant 0 : i32
    %c0_i32_0 = arith.constant 0 : i32
    return %c0_i32 : i32
  }
  func.func @transform_1(%arg0: i32) -> (i32, i32) {
    %c0_i32 = arith.constant 0 : i32
    %c0_i32_0 = arith.constant 0 : i32
    return %arg0, %c0_i32 : i32, i32
  }
  func.func @transform_2(%arg0: i32) -> (i32, i32) {
    %c0_i32 = arith.constant 0 : i32
    %c0_i32_0 = arith.constant 0 : i32
    return %arg0, %c0_i32 : i32, i32
  }
  func.func @transform_3(%arg0: i32) -> (i32, i32) {
    %c0_i32 = arith.constant 0 : i32
    %c0_i32_0 = arith.constant 0 : i32
    return %arg0, %c0_i32 : i32, i32
  }
  func.func @transform_4(%arg0: i32) -> (i32, i32) {
    %c0_i32 = arith.constant 0 : i32
    %c0_i32_0 = arith.constant 0 : i32
    return %arg0, %c0_i32 : i32, i32
  }
}

</mosaic_0001>

<bundles_post_ra>
// kernel: tpu_custom_call.1
= control target key start
LH: loop header
LB: loop body
LE: loop exit
PB: predicated region body
PF: predicated region fallthrough
CT: control target
= control target key end

     0   :  { %s2095_s0 = inlined_call_operand.hbm [shape: f32[2], index: 0, kind: input, shape index: {}]   ;;  %s2096_s1 = inlined_call_operand.hbm [shape: f32[64,2048], index: 1, kind: input, shape index: {}]   ;;  %s2097_s2 = inlined_call_operand.hbm [shape: f32[64,2048], index: 2, kind: input, shape index: {}]   ;;  %s2098_s3 = inlined_call_operand.hbm [shape: f32[64,2048], index: 3, kind: output, shape index: {0}]   ;;  %s2099_s4 = inlined_call_operand.hbm [shape: f32[64,2048], index: 4, kind: output, shape index: {1}]  }
   0x1   :  { %2103 = sst [smem:[#allocation17_spill]] %s2095_s0 }
   0x2   :  { %10 = vsyncpa [#allocation5], 0 }
   0x3   :  { %11 = vsyncpa [#allocation3], 0 }
   0x4   :  { %13 = vsyncpa [#allocation3 + $0x1], 0 }
   0x5   :  { %14 = vsyncpa [#allocation8], 0 }
   0x6   :  { %16 = vsyncpa [#allocation8 + $0x1], 0 }
   0x7   :  { %17 = vsyncpa [#allocation4], 0 }
   0x8   :  { %19 = vsyncpa [#allocation4 + $0x1], 0 }
   0x9   :  { %20 = vsyncpa [#allocation11], 0 }
   0xa   :  { %22 = vsyncpa [#allocation11 + $0x1], 0  ;;  %s1291_s15 = smov 0   ;;  %s1293_s16 = smov 0  }
   0xb   :  { %s1295_s17 = smov 0   ;;  %s1297_s18 = smov 0  }
   0xc LB: > { %s1312_s19 = sadd.s32 4294967295, %s1255_s18   ;;  %s978_s20 = sadd.s32 4294967294, %s1255_s18   ;;  %s1255_s18 = sphi %s1297_s18, %s2121_s18   ;;  %s1251_s17 = sphi %s1295_s17, %s2120_s17   ;;  %s1247_s16 = sphi %s1293_s16, %s2119_s16   ;;  %s1243_s15 = sphi %s1291_s15, %s2118_s15  }
   0xd   : > { %s1316_s21 = sadd.s32 1, %s1255_s18   ;;  %s56_s22 = sadd.s32 1, %s1251_s17 }
   0xe   : > { %s53_s23 = ssub.s32 %s1255_s18, %s1316_s21  ;;  %p63_p0 = scmp.ne.s32.totalorder %s1251_s17, %s1247_s16 }
   0xf   : > { %p54_p1 = scmp.eq.s32.totalorder %s53_s23, 0  ;;  %p64_p2 = scmp.eq.s32.totalorder %s1255_s18, 0 }
  0x10   : > { %p69_p3 = scmp.ne.s32.totalorder %s1247_s16, %s1243_s15  ;;  %p2100_p4 = scmp.eq.s32.totalorder %s1312_s19, 0 }
  0x11   : > { %s1328_s24 = scalar_select %p54_p1, %s1251_s17, %s56_s22  }
  0x12   : > { %p1330_p5 = por %p64_p2, %p63_p0  ;;  %p1336_p6 = por %p2100_p4, %p69_p3 }
  0x13   : > { %p119_p7 = scmp.eq.s32.totalorder %s1312_s19, 1  ;;  %p125_p8 = scmp.eq.s32.totalorder %s978_s20, 1 }
  0x14   : > { %s2105_s26 = scalar_select %p1336_p6, 1, 0 }
  0x15   : > { %p979_p9 = scmp.ge.s32.totalorder %s1255_s18, 1  ;;  %p158_p10 = scmp.lt.s32.totalorder %s1255_s18, 3 }
  0x16   : > { %p1343_p11 = por %p119_p7, %p63_p0  ;;  %p1347_p12 = por %p125_p8, %p69_p3 }
  0x17   : > { %p1351_p13 = pnand %p979_p9, %p158_p10  ;;  %p1046_p4 = scmp.lt.s32.totalorder %s1255_s18, 2 }
  0x18   : > { %s2106_s27 = scalar_select %p1343_p11, 1, 0 }
  0x19   : > { %s2107_s28 = scalar_select %p1347_p12, 1, 0 }
  0x1a   : > { %p1027_p2 = pneg %p1351_p13  ;;  %s1360_s30 = sand.u32 1, %s1251_s17  }
  0x1b   : > { %s1008_s5 = sshll.u32 %s1255_s18, 13  ;;  %p2109_p0 = scmp.eq.s32.totalorder %s1312_s19, 0 }
  0x1c   : > { %p1367_p7 = pnand %p1046_p4, %p1330_p5  ;;  %s982_s7 = sshll.u32 %s1360_s30, 9 }
  0x1d   : > { %p1028_p3 = pnand %p1027_p2, %p2109_p0  ;;  %s1257_s8 = smov [#allocation2]  }
  0x1e   : > { %s2111_s0 = sld [smem:[#allocation17_spill]]  ;;  %s1380_s13 = scalar_lea.hbm %s2096_s1, %s1008_s5 }
  0x1f   : > { %s184_s14 = scalar_lea.vmem [#allocation6], %s982_s7  ;;  %s181_s22 = scalar_lea.sflag [#allocation3], %s1360_s30 }
  0x20   : > { %s192_s20 = sshll.u32 %s184_s14, 4  ;;  %s1097_s23 = scalar_lea.hbm %s1380_s13, 8192  ;;  %s1384_s20 = int_to_ptr.vmem [resolvable:$true] %s192_s20 }
  0x21   : > { %p1098_p4 = scmp.ne.s32.totalorder %s1380_s13, %s1097_s23  ;;  %p1099_p5 = pneg %p1367_p7 }
  0x22   : > { %s1102_s9 = scalar_lea.hbm %s2096_s1, 16384  ;;  %p1103_p10 = scmp.lt.s32.totalorder %s1380_s13, %s2096_s1 }
  0x23   : > { %p1100_p8 = pnand %p1099_p5, %p1098_p4  ;;  %p1104_p2 = scmp.lt.s32.totalorder %s1102_s9, %s1097_s23 }
  0x24   : > { %1030 = dma.hbm_to_smem (!%p1028_p3), %s2111_s0, 16, %s1257_s8, [#allocation5]  }
  0x25   : > { %p1101_p9 = pneg %p1100_p8  ;;  %p1105_p0 = por %p1104_p2, %p1103_p10 }
  0x27   : > { %p1106_p3 = pnand %p1105_p0, %p1101_p9 }
  0x29   : > { %1109 = shalt.err (!%p1106_p3)
}
  0x2a   : > { %s1110_s12 = scalar_lea.vmem %s1384_s20, 8192  ;;  %s1258_s14 = smov [#allocation6]  }
  0x2b   : > { %p1111_p1 = scmp.ne.s32.totalorder %s1384_s20, %s1110_s12  ;;  %s1115_s25 = sshll.u32 %s1258_s14, 4  ;;  %s1116_s25 = int_to_ptr.vmem [resolvable:$false] %s1115_s25 }
  0x2c   : > { %s1117_s8 = scalar_lea.vmem %s1116_s25, 16384  ;;  %p1118_p12 = scmp.lt.s32.totalorder %s1384_s20, %s1116_s25 }
  0x2d   : > { %p1113_p4 = pnand %p1111_p1, %p1099_p5  ;;  %p1119_p11 = scmp.lt.s32.totalorder %s1117_s8, %s1110_s12 }
  0x2f   : > { %p1114_p8 = pneg %p1113_p4  ;;  %p1120_p6 = por %p1119_p11, %p1118_p12 }
  0x31   : > { %p1121_p10 = pnand %p1120_p6, %p1114_p8 }
  0x33   : > { %1124 = shalt.err (!%p1121_p10)
}
  0x34   : > { %s1259_s23 = smov 2048   ;;  %s1260_s9 = smov 128  }
  0x35   : > { %1034 = dma.hbm_to_vmem [thread:$0]  (!%p1367_p7), %s1380_s13, 8192, %s1384_s20, %s181_s22, %s1259_s23, %s1259_s23, %s1260_s9  }
  0x36   : > { %s1421_s12 = scalar_lea.hbm %s2097_s2, %s1008_s5  ;;  %s206_s14 = scalar_lea.vmem [#allocation7], %s982_s7 }
  0x37   : > { %s214_s25 = sshll.u32 %s206_s14, 4  ;;  %s203_s8 = scalar_lea.sflag [#allocation8], %s1360_s30  ;;  %s1425_s25 = int_to_ptr.vmem [resolvable:$true] %s214_s25 }
  0x38   : > { %s1125_s0 = scalar_lea.hbm %s1421_s12, 8192  ;;  %s1130_s5 = scalar_lea.hbm %s2097_s2, 16384 }
  0x39   : > { %p1126_p6 = scmp.ne.s32.totalorder %s1421_s12, %s1125_s0  ;;  %p1131_p1 = scmp.lt.s32.totalorder %s1421_s12, %s2097_s2 }
  0x3a   : > { %p1132_p9 = scmp.lt.s32.totalorder %s1130_s5, %s1125_s0 }
  0x3b   : > { %p1128_p11 = pnand %p1126_p6, %p1099_p5 }
  0x3c   : > { %p1133_p2 = por %p1132_p9, %p1131_p1 }
  0x3d   : > { %p1129_p12 = pneg %p1128_p11 }
  0x3f   : > { %p1134_p0 = pnand %p1133_p2, %p1129_p12 }
  0x41   : > { %1137 = shalt.err (!%p1134_p0)
}
  0x42   : > { %s1138_s30 = scalar_lea.vmem %s1425_s25, 8192  ;;  %s1261_s7 = smov [#allocation7]  }
  0x43   : > { %p1139_p3 = scmp.ne.s32.totalorder %s1425_s25, %s1138_s30  ;;  %s1143_s11 = sshll.u32 %s1261_s7, 4  ;;  %s1144_s11 = int_to_ptr.vmem [resolvable:$false] %s1143_s11 }
  0x44   : > { %s1145_s14 = scalar_lea.vmem %s1144_s11, 16384  ;;  %p1146_p10 = scmp.lt.s32.totalorder %s1425_s25, %s1144_s11 }
  0x45   : > { %p1141_p4 = pnand %p1139_p3, %p1099_p5  ;;  %p1147_p6 = scmp.lt.s32.totalorder %s1145_s14, %s1138_s30 }
  0x47   : > { %p1142_p8 = pneg %p1141_p4  ;;  %p1148_p11 = por %p1147_p6, %p1146_p10 }
  0x49   : > { %p1149_p1 = pnand %p1148_p11, %p1142_p8 }
  0x4b   : > { %1152 = shalt.err (!%p1149_p1)
}
  0x4c   : > { %1037 = dma.hbm_to_vmem [thread:$0]  (!%p1367_p7), %s1421_s12, 8192, %s1425_s25, %s203_s8, %s1259_s23, %s1259_s23, %s1260_s9  }
  0x4d   : > { %226 = sbr.rel (%p1351_p13) target bundleno = 203 (0xcb), region = 32  ;;  %p2112_p5 = scmp.eq.s32.totalorder (!%p1351_p13), %s1312_s19, 0 }
  0x52   : > { %1222 = dma.done.wait (%p2112_p5), [#allocation5], 16   ;;  %p2113_p12 = pmov %p2112_p5 }
  0x53   : > { %s1460_s0 = sand.u32 1, %s1247_s16   ;;  %p2114_p7 = scmp.ne.s32.totalorder %s2105_s26, 0 }
  0x54   : > { %1224 = vsyncadd (%p2113_p12), [#allocation5], 4294967280  ;;  %s1463_s6 = sshll.u32 %s1460_s0, 9  ;;  %s233_s13 = scalar_lea.sflag [#allocation3], %s1460_s0 }
  0x55   : > { %s1467_s23 = scalar_lea.vmem [#allocation6], %s1463_s6 }
  0x56   : > { %1226 = dma.done.wait (%p2114_p7), %s233_s13, 8192  }
  0x57   : > { %1228 = vsyncadd (%p2114_p7), %s233_s13, 4294959104  ;;  %s242_s29 = scalar_lea.sflag [#allocation8], %s1460_s0  ;;  %s1475_s9 = scalar_lea.vmem [#allocation7], %s1463_s6 }
  0x58   : > { %1230 = dma.done.wait (%p2114_p7), %s242_s29, 8192  }
  0x59   : > { %1232 = vsyncadd (%p2114_p7), %s242_s29, 4294959104 }
  0x5a   : > { %250 = sfence }
  0x5b   : > { %s285_s12 = sld [smem:[#allocation2]]  ;;  %v287_v0 = vld [vmem:[%s1467_s23] sm:$0xff]  ;;  %v288_v1 = vld [vmem:[%s1467_s23 + $0x8] sm:$0xff]  ;;  %v289_v2 = vld [vmem:[%s1467_s23 + $0x10] sm:$0xff]  ;;  %s1517_s26 = scalar_lea.vmem [#allocation9], %s1463_s6 }
  0x5c   : > { %s996_s25 = sld [smem:[#allocation2 + $0x1]]  ;;  %v290_v3 = vld [vmem:[%s1467_s23 + $0x18] sm:$0xff]  ;;  %v291_v4 = vld [vmem:[%s1467_s23 + $0x20] sm:$0xff]  ;;  %v292_v5 = vld [vmem:[%s1467_s23 + $0x28] sm:$0xff]  ;;  %s1012_s8 = sshll.u32 %s1312_s19, 13 }
  0x5d   : > { %v293_v6 = vld [vmem:[%s1467_s23 + $0x30] sm:$0xff]  ;;  %v294_v8 = vld [vmem:[%s1467_s23 + $0x38] sm:$0xff]  ;;  %v295_v13 = vld [vmem:[%s1467_s23 + $0x40] sm:$0xff]  ;;  %s821_s20 = sshll.u32 %s1517_s26, 4  ;;  %s1758_s10 = scalar_lea.hbm %s2098_s3, %s1012_s8  ;;  %s1760_s20 = int_to_ptr.vmem [resolvable:$true] %s821_s20 }
  0x5e   : > { %v296_v18 = vld [vmem:[%s1467_s23 + $0x48] sm:$0xff]  ;;  %v297_v19 = vld [vmem:[%s1467_s23 + $0x50] sm:$0xff]  ;;  %v298_v20 = vld [vmem:[%s1467_s23 + $0x58] sm:$0xff]  ;;  %s1790_s30 = scalar_lea.vmem [#allocation10], %s1463_s6  ;;  %s802_s7 = scalar_lea.sflag [#allocation4], %s1460_s0 }
  0x5f   : > { %v299_v25 = vld [vmem:[%s1467_s23 + $0x60] sm:$0xff]  ;;  %v300_v26 = vld [vmem:[%s1467_s23 + $0x68] sm:$0xff]  ;;  %v301_v27 = vld [vmem:[%s1467_s23 + $0x70] sm:$0xff]  ;;  %s1153_s11 = scalar_lea.vmem %s1760_s20, 8192  ;;  %p2115_p9 = scmp.ne.s32.totalorder %s2106_s27, 0 }
  0x60   : > { %v302_v32 = vld [vmem:[%s1467_s23 + $0x78] sm:$0xff]  ;;  %v303_v37 = vld [vmem:[%s1467_s23 + $0x80] sm:$0xff]  ;;  %v304_v42 = vld [vmem:[%s1467_s23 + $0x88] sm:$0xff]  ;;  %p1154_p13 = scmp.ne.s32.totalorder %s1760_s20, %s1153_s11  ;;  %s1262_s14 = smov [#allocation9]  }
  0x61   : > { %v1488_v7 = vstv %s285_s12  ;;  %v305_v43 = vld [vmem:[%s1467_s23 + $0x90] sm:$0xff]  ;;  %v306_v44 = vld [vmem:[%s1467_s23 + $0x98] sm:$0xff]  ;;  %v307_v49 = vld [vmem:[%s1467_s23 + $0xa0] sm:$0xff]  ;;  %s1157_s6 = sshll.u32 %s1262_s14, 4  ;;  %s1158_s6 = int_to_ptr.vmem [resolvable:$false] %s1157_s6 }
  0x62   : > { %v352_v9 = vmul.f32 %v1488_v7, %v287_v0  ;;  %v1492_v10 = vstv %s996_s25  ;;  %v353_v11 = vmul.f32 %v1488_v7, %v288_v1  ;;  %v354_v12 = vmul.f32 %v1488_v7, %v289_v2  ;;  %v308_v50 = vld [vmem:[%s1467_s23 + $0xa8] sm:$0xff]  ;;  %v309_v51 = vld [vmem:[%s1467_s23 + $0xb0] sm:$0xff]  ;;  %v310_v56 = vld [vmem:[%s1467_s23 + $0xb8] sm:$0xff]  ;;  %p1155_p2 = pnand %p1154_p13, %p2115_p9  ;;  %s1159_s13 = scalar_lea.vmem %s1158_s6, 16384 }
  0x63   : > { %v355_v14 = vmul.f32 %v1488_v7, %v290_v3  ;;  %v356_v15 = vmul.f32 %v1488_v7, %v291_v4  ;;  %v357_v16 = vmul.f32 %v1488_v7, %v292_v5  ;;  %v358_v17 = vmul.f32 %v1488_v7, %v293_v6  ;;  %v311_v61 = vld [vmem:[%s1467_s23 + $0xc0] sm:$0xff]  ;;  %v312_v2 = vld [vmem:[%s1467_s23 + $0xc8] sm:$0xff]  ;;  %v313_v3 = vld [vmem:[%s1467_s23 + $0xd0] sm:$0xff]  ;;  %p1160_p3 = scmp.lt.s32.totalorder %s1760_s20, %s1158_s6  ;;  %p1161_p4 = scmp.lt.s32.totalorder %s1159_s13, %s1153_s11 }
  0x64   : > { %v417_v21 = vadd.f32 %v1492_v10, %v352_v9  ;;  %v418_v22 = vadd.f32 %v1492_v10, %v353_v11  ;;  %v419_v23 = vadd.f32 %v1492_v10, %v354_v12  ;;  %v359_v24 = vmul.f32 %v1488_v7, %v294_v8  ;;  %v314_v4 = vld [vmem:[%s1467_s23 + $0xd8] sm:$0xff]  ;;  %v315_v11 = vld [vmem:[%s1467_s23 + $0xe0] sm:$0xff]  ;;  %v316_v12 = vld [vmem:[%s1467_s23 + $0xe8] sm:$0xff]  ;;  %p1156_p0 = pneg %p1155_p2 }
  0x65   : > { %v420_v28 = vadd.f32 %v1492_v10, %v355_v14  ;;  %v421_v29 = vadd.f32 %v1492_v10, %v356_v15  ;;  %v422_v30 = vadd.f32 %v1492_v10, %v357_v16  ;;  %v423_v31 = vadd.f32 %v1492_v10, %v358_v17  ;;  %p1162_p8 = por %p1161_p4, %p1160_p3 }
  0x66   : > { %481 = vst [vmem:[%s1517_s26] sm:$0xff] %v417_v21  ;;  %482 = vst [vmem:[%s1517_s26 + $0x8] sm:$0xff] %v418_v22  ;;  %v424_v33 = vadd.f32 %v1492_v10, %v359_v24  ;;  %v360_v34 = vmul.f32 %v1488_v7, %v295_v13  ;;  %v361_v35 = vmul.f32 %v1488_v7, %v296_v18  ;;  %v317_v13 = vld [vmem:[%s1467_s23 + $0xf0] sm:$0xff]  ;;  %v318_v18 = vld [vmem:[%s1467_s23 + $0xf8] sm:$0xff] }
  0x67   : > { %483 = vst [vmem:[%s1517_s26 + $0x10] sm:$0xff] %v419_v23  ;;  %v362_v36 = vmul.f32 %v1488_v7, %v297_v19  ;;  %484 = vst [vmem:[%s1517_s26 + $0x18] sm:$0xff] %v420_v28  ;;  %v363_v38 = vmul.f32 %v1488_v7, %v298_v20  ;;  %v364_v39 = vmul.f32 %v1488_v7, %v299_v25  ;;  %v319_v23 = vld [vmem:[%s1467_s23 + $0x100] sm:$0xff]  ;;  %v320_v28 = vld [vmem:[%s1467_s23 + $0x108] sm:$0xff]  ;;  %p1163_p10 = pnand %p1162_p8, %p1156_p0 }
  0x68   : > { %485 = vst [vmem:[%s1517_s26 + $0x20] sm:$0xff] %v421_v29  ;;  %486 = vst [vmem:[%s1517_s26 + $0x28] sm:$0xff] %v422_v30  ;;  %v365_v40 = vmul.f32 %v1488_v7, %v300_v26  ;;  %v366_v41 = vmul.f32 %v1488_v7, %v301_v27  ;;  %v425_v45 = vadd.f32 %v1492_v10, %v360_v34  ;;  %v321_v29 = vld [vmem:[%s1467_s23 + $0x110] sm:$0xff]  ;;  %v322_v30 = vld [vmem:[%s1467_s23 + $0x118] sm:$0xff] }
  0x69   : > { %487 = vst [vmem:[%s1517_s26 + $0x30] sm:$0xff] %v423_v31  ;;  %488 = vst [vmem:[%s1517_s26 + $0x38] sm:$0xff] %v424_v33  ;;  %v426_v46 = vadd.f32 %v1492_v10, %v361_v35  ;;  %v427_v47 = vadd.f32 %v1492_v10, %v362_v36  ;;  %v367_v48 = vmul.f32 %v1488_v7, %v302_v32  ;;  %v323_v35 = vld [vmem:[%s1467_s23 + $0x120] sm:$0xff]  ;;  %v324_v36 = vld [vmem:[%s1467_s23 + $0x128] sm:$0xff] }
  0x6a   : > { %v428_v52 = vadd.f32 %v1492_v10, %v363_v38  ;;  %v429_v53 = vadd.f32 %v1492_v10, %v364_v39  ;;  %v430_v54 = vadd.f32 %v1492_v10, %v365_v40  ;;  %v431_v55 = vadd.f32 %v1492_v10, %v366_v41  ;;  %489 = vst [vmem:[%s1517_s26 + $0x40] sm:$0xff] %v425_v45 }
  0x6b   : > { %490 = vst [vmem:[%s1517_s26 + $0x48] sm:$0xff] %v426_v46  ;;  %491 = vst [vmem:[%s1517_s26 + $0x50] sm:$0xff] %v427_v47  ;;  %v432_v57 = vadd.f32 %v1492_v10, %v367_v48  ;;  %v368_v58 = vmul.f32 %v1488_v7, %v303_v37  ;;  %v369_v59 = vmul.f32 %v1488_v7, %v304_v42  ;;  %v325_v37 = vld [vmem:[%s1467_s23 + $0x130] sm:$0xff]  ;;  %v326_v42 = vld [vmem:[%s1467_s23 + $0x138] sm:$0xff] }
  0x6c   : > { %v370_v60 = vmul.f32 %v1488_v7, %v305_v43  ;;  %492 = vst [vmem:[%s1517_s26 + $0x58] sm:$0xff] %v428_v52  ;;  %493 = vst [vmem:[%s1517_s26 + $0x60] sm:$0xff] %v429_v53  ;;  %v371_v62 = vmul.f32 %v1488_v7, %v306_v44  ;;  %v372_v63 = vmul.f32 %v1488_v7, %v307_v49  ;;  %v327_v47 = vld [vmem:[%s1467_s23 + $0x140] sm:$0xff]  ;;  %v328_v52 = vld [vmem:[%s1467_s23 + $0x148] sm:$0xff] }
  0x6d   : > { %494 = vst [vmem:[%s1517_s26 + $0x68] sm:$0xff] %v430_v54  ;;  %495 = vst [vmem:[%s1517_s26 + $0x70] sm:$0xff] %v431_v55  ;;  %v373_v0 = vmul.f32 %v1488_v7, %v308_v50  ;;  %v374_v1 = vmul.f32 %v1488_v7, %v309_v51  ;;  %v433_v5 = vadd.f32 %v1492_v10, %v368_v58  ;;  %v329_v53 = vld [vmem:[%s1467_s23 + $0x150] sm:$0xff]  ;;  %v330_v54 = vld [vmem:[%s1467_s23 + $0x158] sm:$0xff] }
  0x6e   : > { %496 = vst [vmem:[%s1517_s26 + $0x78] sm:$0xff] %v432_v57  ;;  %v434_v6 = vadd.f32 %v1492_v10, %v369_v59  ;;  %v435_v8 = vadd.f32 %v1492_v10, %v370_v60  ;;  %v375_v9 = vmul.f32 %v1488_v7, %v310_v56  ;;  %v436_v14 = vadd.f32 %v1492_v10, %v371_v62  ;;  %v331_v59 = vld [vmem:[%s1467_s23 + $0x160] sm:$0xff]  ;;  %v332_v60 = vld [vmem:[%s1467_s23 + $0x168] sm:$0xff] }
  0x6f   : > { %v437_v15 = vadd.f32 %v1492_v10, %v372_v63  ;;  %v438_v16 = vadd.f32 %v1492_v10, %v373_v0  ;;  %v439_v17 = vadd.f32 %v1492_v10, %v374_v1  ;;  %497 = vst [vmem:[%s1517_s26 + $0x80] sm:$0xff] %v433_v5  ;;  %v376_v20 = vmul.f32 %v1488_v7, %v311_v61  ;;  %v333_v61 = vld [vmem:[%s1467_s23 + $0x170] sm:$0xff] }
  0x70   : > { %498 = vst [vmem:[%s1517_s26 + $0x88] sm:$0xff] %v434_v6  ;;  %499 = vst [vmem:[%s1517_s26 + $0x90] sm:$0xff] %v435_v8  ;;  %v440_v19 = vadd.f32 %v1492_v10, %v375_v9  ;;  %v377_v21 = vmul.f32 %v1488_v7, %v312_v2  ;;  %v378_v22 = vmul.f32 %v1488_v7, %v313_v3  ;;  %v334_v2 = vld [vmem:[%s1467_s23 + $0x178] sm:$0xff]  ;;  %v335_v8 = vld [vmem:[%s1467_s23 + $0x180] sm:$0xff] }
  0x71   : > { %500 = vst [vmem:[%s1517_s26 + $0x98] sm:$0xff] %v436_v14  ;;  %501 = vst [vmem:[%s1517_s26 + $0xa0] sm:$0xff] %v437_v15  ;;  %v379_v24 = vmul.f32 %v1488_v7, %v314_v4  ;;  %v380_v25 = vmul.f32 %v1488_v7, %v315_v11  ;;  %v381_v26 = vmul.f32 %v1488_v7, %v316_v12  ;;  %v336_v14 = vld [vmem:[%s1467_s23 + $0x188] sm:$0xff]  ;;  %v337_v15 = vld [vmem:[%s1467_s23 + $0x190] sm:$0xff] }
  0x72   : > { %502 = vst [vmem:[%s1517_s26 + $0xa8] sm:$0xff] %v438_v16  ;;  %503 = vst [vmem:[%s1517_s26 + $0xb0] sm:$0xff] %v439_v17  ;;  %v382_v27 = vmul.f32 %v1488_v7, %v317_v13  ;;  %v441_v31 = vadd.f32 %v1492_v10, %v376_v20  ;;  %v442_v32 = vadd.f32 %v1492_v10, %v377_v21  ;;  %v338_v16 = vld [vmem:[%s1467_s23 + $0x198] sm:$0xff]  ;;  %v339_v21 = vld [vmem:[%s1467_s23 + $0x1a0] sm:$0xff] }
  0x73   : > { %504 = vst [vmem:[%s1517_s26 + $0xb8] sm:$0xff] %v440_v19  ;;  %v443_v33 = vadd.f32 %v1492_v10, %v378_v22  ;;  %v383_v34 = vmul.f32 %v1488_v7, %v318_v18  ;;  %v444_v38 = vadd.f32 %v1492_v10, %v379_v24  ;;  %v445_v39 = vadd.f32 %v1492_v10, %v380_v25  ;;  %v340_v22 = vld [vmem:[%s1467_s23 + $0x1a8] sm:$0xff] }
  0x74   : > { %v446_v40 = vadd.f32 %v1492_v10, %v381_v26  ;;  %v447_v41 = vadd.f32 %v1492_v10, %v382_v27  ;;  %505 = vst [vmem:[%s1517_s26 + $0xc0] sm:$0xff] %v441_v31  ;;  %506 = vst [vmem:[%s1517_s26 + $0xc8] sm:$0xff] %v442_v32  ;;  %v384_v44 = vmul.f32 %v1488_v7, %v319_v23  ;;  %v341_v23 = vld [vmem:[%s1467_s23 + $0x1b0] sm:$0xff] }
  0x75   : > { %507 = vst [vmem:[%s1517_s26 + $0xd0] sm:$0xff] %v443_v33  ;;  %v448_v43 = vadd.f32 %v1492_v10, %v383_v34  ;;  %v385_v45 = vmul.f32 %v1488_v7, %v320_v28  ;;  %v386_v46 = vmul.f32 %v1488_v7, %v321_v29  ;;  %508 = vst [vmem:[%s1517_s26 + $0xd8] sm:$0xff] %v444_v38  ;;  %v342_v28 = vld [vmem:[%s1467_s23 + $0x1b8] sm:$0xff]  ;;  %v343_v33 = vld [vmem:[%s1467_s23 + $0x1c0] sm:$0xff] }
  0x76   : > { %509 = vst [vmem:[%s1517_s26 + $0xe0] sm:$0xff] %v445_v39  ;;  %510 = vst [vmem:[%s1517_s26 + $0xe8] sm:$0xff] %v446_v40  ;;  %v387_v48 = vmul.f32 %v1488_v7, %v322_v30  ;;  %v388_v49 = vmul.f32 %v1488_v7, %v323_v35  ;;  %v389_v50 = vmul.f32 %v1488_v7, %v324_v36  ;;  %v344_v38 = vld [vmem:[%s1467_s23 + $0x1c8] sm:$0xff]  ;;  %v345_v39 = vld [vmem:[%s1467_s23 + $0x1d0] sm:$0xff] }
  0x77   : > { %511 = vst [vmem:[%s1517_s26 + $0xf0] sm:$0xff] %v447_v41  ;;  %v390_v51 = vmul.f32 %v1488_v7, %v325_v37  ;;  %512 = vst [vmem:[%s1517_s26 + $0xf8] sm:$0xff] %v448_v43  ;;  %v449_v55 = vadd.f32 %v1492_v10, %v384_v44  ;;  %v450_v56 = vadd.f32 %v1492_v10, %v385_v45  ;;  %v346_v40 = vld [vmem:[%s1467_s23 + $0x1d8] sm:$0xff]  ;;  %v347_v45 = vld [vmem:[%s1467_s23 + $0x1e0] sm:$0xff] }
  0x78   : > { %v451_v57 = vadd.f32 %v1492_v10, %v386_v46  ;;  %v391_v58 = vmul.f32 %v1488_v7, %v326_v42  ;;  %v452_v62 = vadd.f32 %v1492_v10, %v387_v48  ;;  %v453_v63 = vadd.f32 %v1492_v10, %v388_v49  ;;  %v348_v46 = vld [vmem:[%s1467_s23 + $0x1e8] sm:$0xff] }
  0x79   : > { %v454_v0 = vadd.f32 %v1492_v10, %v389_v50  ;;  %v455_v1 = vadd.f32 %v1492_v10, %v390_v51  ;;  %513 = vst [vmem:[%s1517_s26 + $0x100] sm:$0xff] %v449_v55  ;;  %514 = vst [vmem:[%s1517_s26 + $0x108] sm:$0xff] %v450_v56  ;;  %v392_v4 = vmul.f32 %v1488_v7, %v327_v47  ;;  %v349_v47 = vld [vmem:[%s1467_s23 + $0x1f0] sm:$0xff] }
  0x7a   : > { %515 = vst [vmem:[%s1517_s26 + $0x110] sm:$0xff] %v451_v57  ;;  %v456_v3 = vadd.f32 %v1492_v10, %v391_v58  ;;  %v393_v5 = vmul.f32 %v1488_v7, %v328_v52  ;;  %v394_v6 = vmul.f32 %v1488_v7, %v329_v53  ;;  %516 = vst [vmem:[%s1517_s26 + $0x118] sm:$0xff] %v452_v62  ;;  %v350_v52 = vld [vmem:[%s1467_s23 + $0x1f8] sm:$0xff]  ;;  %v545_v57 = vld [vmem:[%s1475_s9] sm:$0xff] }
  0x7b   : > { %517 = vst [vmem:[%s1517_s26 + $0x120] sm:$0xff] %v453_v63  ;;  %518 = vst [vmem:[%s1517_s26 + $0x128] sm:$0xff] %v454_v0  ;;  %v395_v9 = vmul.f32 %v1488_v7, %v330_v54  ;;  %v396_v11 = vmul.f32 %v1488_v7, %v331_v59  ;;  %v397_v12 = vmul.f32 %v1488_v7, %v332_v60  ;;  %v546_v62 = vld [vmem:[%s1475_s9 + $0x8] sm:$0xff]  ;;  %v547_v63 = vld [vmem:[%s1475_s9 + $0x10] sm:$0xff] }
  0x7c   : > { %519 = vst [vmem:[%s1517_s26 + $0x130] sm:$0xff] %v455_v1  ;;  %v398_v13 = vmul.f32 %v1488_v7, %v333_v61  ;;  %520 = vst [vmem:[%s1517_s26 + $0x138] sm:$0xff] %v456_v3  ;;  %v457_v17 = vadd.f32 %v1492_v10, %v392_v4  ;;  %v458_v18 = vadd.f32 %v1492_v10, %v393_v5  ;;  %v548_v0 = vld [vmem:[%s1475_s9 + $0x18] sm:$0xff]  ;;  %v549_v5 = vld [vmem:[%s1475_s9 + $0x20] sm:$0xff] }
  0x7d   : > { %v459_v19 = vadd.f32 %v1492_v10, %v394_v6  ;;  %v399_v20 = vmul.f32 %v1488_v7, %v334_v2  ;;  %v460_v24 = vadd.f32 %v1492_v10, %v395_v9  ;;  %v461_v25 = vadd.f32 %v1492_v10, %v396_v11  ;;  %v550_v6 = vld [vmem:[%s1475_s9 + $0x28] sm:$0xff] }
  0x7e   : > { %v462_v26 = vadd.f32 %v1492_v10, %v397_v12  ;;  %v463_v27 = vadd.f32 %v1492_v10, %v398_v13  ;;  %521 = vst [vmem:[%s1517_s26 + $0x140] sm:$0xff] %v457_v17  ;;  %522 = vst [vmem:[%s1517_s26 + $0x148] sm:$0xff] %v458_v18  ;;  %v400_v30 = vmul.f32 %v1488_v7, %v335_v8  ;;  %v551_v8 = vld [vmem:[%s1475_s9 + $0x30] sm:$0xff] }
  0x7f   : > { %523 = vst [vmem:[%s1517_s26 + $0x150] sm:$0xff] %v459_v19  ;;  %v464_v29 = vadd.f32 %v1492_v10, %v399_v20  ;;  %v401_v31 = vmul.f32 %v1488_v7, %v336_v14  ;;  %v402_v32 = vmul.f32 %v1488_v7, %v337_v15  ;;  %524 = vst [vmem:[%s1517_s26 + $0x158] sm:$0xff] %v460_v24  ;;  %v552_v14 = vld [vmem:[%s1475_s9 + $0x38] sm:$0xff]  ;;  %v553_v19 = vld [vmem:[%s1475_s9 + $0x40] sm:$0xff] }
  0x80   : > { %525 = vst [vmem:[%s1517_s26 + $0x160] sm:$0xff] %v461_v25  ;;  %526 = vst [vmem:[%s1517_s26 + $0x168] sm:$0xff] %v462_v26  ;;  %v403_v34 = vmul.f32 %v1488_v7, %v338_v16  ;;  %v404_v35 = vmul.f32 %v1488_v7, %v339_v21  ;;  %v405_v36 = vmul.f32 %v1488_v7, %v340_v22  ;;  %v554_v24 = vld [vmem:[%s1475_s9 + $0x48] sm:$0xff]  ;;  %v555_v25 = vld [vmem:[%s1475_s9 + $0x50] sm:$0xff] }
  0x81   : > { %527 = vst [vmem:[%s1517_s26 + $0x170] sm:$0xff] %v463_v27  ;;  %v406_v37 = vmul.f32 %v1488_v7, %v341_v23  ;;  %528 = vst [vmem:[%s1517_s26 + $0x178] sm:$0xff] %v464_v29  ;;  %v465_v41 = vadd.f32 %v1492_v10, %v400_v30  ;;  %v466_v42 = vadd.f32 %v1492_v10, %v401_v31  ;;  %v556_v26 = vld [vmem:[%s1475_s9 + $0x58] sm:$0xff]  ;;  %v557_v31 = vld [vmem:[%s1475_s9 + $0x60] sm:$0xff] }
  0x82   : > { %v467_v43 = vadd.f32 %v1492_v10, %v402_v32  ;;  %v407_v44 = vmul.f32 %v1488_v7, %v342_v28  ;;  %v468_v48 = vadd.f32 %v1492_v10, %v403_v34  ;;  %v469_v49 = vadd.f32 %v1492_v10, %v404_v35  ;;  %v558_v32 = vld [vmem:[%s1475_s9 + $0x68] sm:$0xff] }
  0x83   : > { %v470_v50 = vadd.f32 %v1492_v10, %v405_v36  ;;  %v471_v51 = vadd.f32 %v1492_v10, %v406_v37  ;;  %529 = vst [vmem:[%s1517_s26 + $0x180] sm:$0xff] %v465_v41  ;;  %530 = vst [vmem:[%s1517_s26 + $0x188] sm:$0xff] %v466_v42  ;;  %v408_v54 = vmul.f32 %v1488_v7, %v343_v33  ;;  %v559_v33 = vld [vmem:[%s1475_s9 + $0x70] sm:$0xff] }
  0x84   : > { %531 = vst [vmem:[%s1517_s26 + $0x190] sm:$0xff] %v467_v43  ;;  %v472_v53 = vadd.f32 %v1492_v10, %v407_v44  ;;  %v409_v55 = vmul.f32 %v1488_v7, %v344_v38  ;;  %v410_v56 = vmul.f32 %v1488_v7, %v345_v39  ;;  %532 = vst [vmem:[%s1517_s26 + $0x198] sm:$0xff] %v468_v48  ;;  %v560_v38 = vld [vmem:[%s1475_s9 + $0x78] sm:$0xff]  ;;  %v1787_v39 = vld [vmem:[%s1475_s9 + $0x80] sm:$0xff] }
  0x85   : > { %533 = vst [vmem:[%s1517_s26 + $0x1a0] sm:$0xff] %v469_v49  ;;  %534 = vst [vmem:[%s1517_s26 + $0x1a8] sm:$0xff] %v470_v50  ;;  %v411_v58 = vmul.f32 %v1488_v7, %v346_v40  ;;  %v412_v59 = vmul.f32 %v1488_v7, %v347_v45  ;;  %v413_v60 = vmul.f32 %v1488_v7, %v348_v46 }
  0x86   : > { %535 = vst [vmem:[%s1517_s26 + $0x1b0] sm:$0xff] %v471_v51  ;;  %v414_v61 = vmul.f32 %v1488_v7, %v349_v47  ;;  %536 = vst [vmem:[%s1517_s26 + $0x1b8] sm:$0xff] %v472_v53  ;;  %v473_v1 = vadd.f32 %v1492_v10, %v408_v54  ;;  %v474_v2 = vadd.f32 %v1492_v10, %v409_v55 }
  0x87   : > { %v475_v3 = vadd.f32 %v1492_v10, %v410_v56  ;;  %v415_v4 = vmul.f32 %v1488_v7, %v350_v52  ;;  %v476_v9 = vadd.f32 %v1492_v10, %v411_v58  ;;  %v477_v11 = vadd.f32 %v1492_v10, %v412_v59 }
  0x88   : > { %v478_v12 = vadd.f32 %v1492_v10, %v413_v60  ;;  %v479_v13 = vadd.f32 %v1492_v10, %v414_v61  ;;  %537 = vst [vmem:[%s1517_s26 + $0x1c0] sm:$0xff] %v473_v1  ;;  %538 = vst [vmem:[%s1517_s26 + $0x1c8] sm:$0xff] %v474_v2  ;;  %v609_v16 = vmul.f32 %v545_v57, %v1488_v7 }
  0x89   : > { %539 = vst [vmem:[%s1517_s26 + $0x1d0] sm:$0xff] %v475_v3  ;;  %v480_v15 = vadd.f32 %v1492_v10, %v415_v4  ;;  %v610_v17 = vmul.f32 %v546_v62, %v1488_v7  ;;  %v611_v18 = vmul.f32 %v547_v63, %v1488_v7  ;;  %540 = vst [vmem:[%s1517_s26 + $0x1d8] sm:$0xff] %v476_v9 }
  0x8a   : > { %541 = vst [vmem:[%s1517_s26 + $0x1e0] sm:$0xff] %v477_v11  ;;  %542 = vst [vmem:[%s1517_s26 + $0x1e8] sm:$0xff] %v478_v12  ;;  %v612_v20 = vmul.f32 %v548_v0, %v1488_v7  ;;  %v613_v21 = vmul.f32 %v549_v5, %v1488_v7  ;;  %v614_v22 = vmul.f32 %v550_v6, %v1488_v7 }
  0x8b   : > { %543 = vst [vmem:[%s1517_s26 + $0x1f0] sm:$0xff] %v479_v13  ;;  %v615_v23 = vmul.f32 %v551_v8, %v1488_v7  ;;  %544 = vst [vmem:[%s1517_s26 + $0x1f8] sm:$0xff] %v480_v15  ;;  %v673_v27 = vadd.f32 %v609_v16, %v1492_v10  ;;  %v674_v28 = vadd.f32 %v610_v17, %v1492_v10 }
  0x8c   : > { %v675_v29 = vadd.f32 %v611_v18, %v1492_v10  ;;  %v616_v30 = vmul.f32 %v552_v14, %v1488_v7  ;;  %v676_v34 = vadd.f32 %v612_v20, %v1492_v10  ;;  %v677_v35 = vadd.f32 %v613_v21, %v1492_v10 }
  0x8d   : > { %v678_v36 = vadd.f32 %v614_v22, %v1492_v10  ;;  %v679_v37 = vadd.f32 %v615_v23, %v1492_v10  ;;  %737 = vst [vmem:[%s1790_s30] sm:$0xff] %v673_v27  ;;  %738 = vst [vmem:[%s1790_s30 + $0x8] sm:$0xff] %v674_v28  ;;  %v617_v41 = vmul.f32 %v553_v19, %v1488_v7 }
  0x8e   : > { %739 = vst [vmem:[%s1790_s30 + $0x10] sm:$0xff] %v675_v29  ;;  %v680_v40 = vadd.f32 %v616_v30, %v1492_v10  ;;  %v618_v42 = vmul.f32 %v554_v24, %v1488_v7  ;;  %v619_v43 = vmul.f32 %v555_v25, %v1488_v7 }
  0x8f   : > { %1166 = shalt.err (!%p1163_p10)
}
  0x90   : > { %s1167_s23 = scalar_lea.hbm %s1758_s10, 8192  ;;  %s1171_s25 = scalar_lea.hbm %s2098_s3, 16384 }
  0x91   : > { %p1168_p6 = scmp.ne.s32.totalorder %s1758_s10, %s1167_s23  ;;  %p1172_p5 = scmp.lt.s32.totalorder %s1758_s10, %s2098_s3 }
  0x92   : > { %p1173_p12 = scmp.lt.s32.totalorder %s1171_s25, %s1167_s23 }
  0x93   : > { %p1169_p11 = pnand %p1168_p6, %p2115_p9 }
  0x94   : > { %p1174_p7 = por %p1173_p12, %p1172_p5 }
  0x95   : > { %p1170_p1 = pneg %p1169_p11 }
  0x97   : > { %p1175_p13 = pnand %p1174_p7, %p1170_p1 }
  0x99   : > { %1178 = shalt.err (!%p1175_p13)
}
  0x9a   : > { %s1263_s22 = smov 2048   ;;  %s1264_s11 = smov 128   ;;  %740 = vst [vmem:[%s1790_s30 + $0x18] sm:$0xff] %v676_v34  ;;  %741 = vst [vmem:[%s1790_s30 + $0x20] sm:$0xff] %v677_v35  ;;  %v620_v44 = vmul.f32 %v556_v26, %v1488_v7  ;;  %v621_v45 = vmul.f32 %v557_v31, %v1488_v7  ;;  %v622_v46 = vmul.f32 %v558_v32, %v1488_v7  ;;  %v562_v48 = vld [vmem:[%s1475_s9 + $0x88] sm:$0xff]  ;;  %v563_v49 = vld [vmem:[%s1475_s9 + $0x90] sm:$0xff] }
  0x9b   : > { %1023 = dma.vmem_to_hbm [thread:$0]  (%p2115_p9), %s1760_s20, 8192, %s1758_s10, %s802_s7, %s1263_s22, %s1263_s22, %s1264_s11   ;;  %v623_v47 = vmul.f32 %v559_v33, %v1488_v7  ;;  %v681_v51 = vadd.f32 %v617_v41, %v1492_v10  ;;  %v682_v52 = vadd.f32 %v618_v42, %v1492_v10  ;;  %v683_v53 = vadd.f32 %v619_v43, %v1492_v10 }
  0x9c   : > { %742 = vst [vmem:[%s1790_s30 + $0x28] sm:$0xff] %v678_v36  ;;  %743 = vst [vmem:[%s1790_s30 + $0x30] sm:$0xff] %v679_v37  ;;  %v564_v50 = vld [vmem:[%s1475_s9 + $0x98] sm:$0xff]  ;;  %v624_v54 = vmul.f32 %v560_v38, %v1488_v7  ;;  %v565_v55 = vld [vmem:[%s1475_s9 + $0xa0] sm:$0xff]  ;;  %v684_v58 = vadd.f32 %v620_v44, %v1492_v10  ;;  %v685_v59 = vadd.f32 %v621_v45, %v1492_v10  ;;  %s2044_s7 = scalar_lea.hbm %s2099_s4, %s1012_s8  ;;  %s807_s14 = scalar_lea.sflag [#allocation11], %s1460_s0 }
  0x9d   : > { %744 = vst [vmem:[%s1790_s30 + $0x38] sm:$0xff] %v680_v40  ;;  %v566_v56 = vld [vmem:[%s1475_s9 + $0xa8] sm:$0xff]  ;;  %v567_v57 = vld [vmem:[%s1475_s9 + $0xb0] sm:$0xff]  ;;  %v686_v60 = vadd.f32 %v622_v46, %v1492_v10  ;;  %v687_v61 = vadd.f32 %v623_v47, %v1492_v10  ;;  %v568_v62 = vld [vmem:[%s1475_s9 + $0xb8] sm:$0xff]  ;;  %v625_v0 = vmul.f32 %v1787_v39, %v1488_v7  ;;  %v626_v1 = vmul.f32 %v562_v48, %v1488_v7  ;;  %s1265_s19 = smov [#allocation10]  }
  0x9e   : > { %745 = vst [vmem:[%s1790_s30 + $0x40] sm:$0xff] %v681_v51  ;;  %746 = vst [vmem:[%s1790_s30 + $0x48] sm:$0xff] %v682_v52  ;;  %v688_v63 = vadd.f32 %v624_v54, %v1492_v10  ;;  %v627_v2 = vmul.f32 %v563_v49, %v1488_v7  ;;  %v569_v3 = vld [vmem:[%s1475_s9 + $0xc0] sm:$0xff]  ;;  %v628_v4 = vmul.f32 %v564_v50, %v1488_v7  ;;  %v570_v9 = vld [vmem:[%s1475_s9 + $0xc8] sm:$0xff]  ;;  %s1183_s13 = sshll.u32 %s1265_s19, 4  ;;  %s1184_s13 = int_to_ptr.vmem [resolvable:$false] %s1183_s13 }
  0x9f   : > { %747 = vst [vmem:[%s1790_s30 + $0x50] sm:$0xff] %v683_v53  ;;  %748 = vst [vmem:[%s1790_s30 + $0x58] sm:$0xff] %v684_v58  ;;  %v629_v5 = vmul.f32 %v565_v55, %v1488_v7  ;;  %v630_v6 = vmul.f32 %v566_v56, %v1488_v7  ;;  %v631_v8 = vmul.f32 %v567_v57, %v1488_v7  ;;  %v571_v11 = vld [vmem:[%s1475_s9 + $0xd0] sm:$0xff]  ;;  %v572_v12 = vld [vmem:[%s1475_s9 + $0xd8] sm:$0xff]  ;;  %s1185_s8 = scalar_lea.vmem %s1184_s13, 16384 }
  0xa0   : > { %749 = vst [vmem:[%s1790_s30 + $0x60] sm:$0xff] %v685_v59  ;;  %750 = vst [vmem:[%s1790_s30 + $0x68] sm:$0xff] %v686_v60  ;;  %v689_v13 = vadd.f32 %v625_v0, %v1492_v10  ;;  %v690_v14 = vadd.f32 %v626_v1, %v1492_v10  ;;  %v691_v15 = vadd.f32 %v627_v2, %v1492_v10  ;;  %v573_v17 = vld [vmem:[%s1475_s9 + $0xe0] sm:$0xff]  ;;  %v574_v18 = vld [vmem:[%s1475_s9 + $0xe8] sm:$0xff] }
  0xa1   : > { %751 = vst [vmem:[%s1790_s30 + $0x70] sm:$0xff] %v687_v61  ;;  %752 = vst [vmem:[%s1790_s30 + $0x78] sm:$0xff] %v688_v63  ;;  %v632_v16 = vmul.f32 %v568_v62, %v1488_v7  ;;  %v575_v19 = vld [vmem:[%s1475_s9 + $0xf0] sm:$0xff]  ;;  %v692_v20 = vadd.f32 %v628_v4, %v1492_v10  ;;  %v693_v21 = vadd.f32 %v629_v5, %v1492_v10  ;;  %v576_v24 = vld [vmem:[%s1475_s9 + $0xf8] sm:$0xff] }
  0xa2   : > { %v694_v22 = vadd.f32 %v630_v6, %v1492_v10  ;;  %v695_v23 = vadd.f32 %v631_v8, %v1492_v10  ;;  %753 = vst [vmem:[%s1790_s30 + $0x80] sm:$0xff] %v689_v13  ;;  %754 = vst [vmem:[%s1790_s30 + $0x88] sm:$0xff] %v690_v14  ;;  %v633_v26 = vmul.f32 %v569_v3, %v1488_v7  ;;  %v577_v29 = vld [vmem:[%s1475_s9 + $0x100] sm:$0xff]  ;;  %v578_v34 = vld [vmem:[%s1475_s9 + $0x108] sm:$0xff] }
  0xa3   : > { %755 = vst [vmem:[%s1790_s30 + $0x90] sm:$0xff] %v691_v15  ;;  %v696_v25 = vadd.f32 %v632_v16, %v1492_v10  ;;  %v634_v27 = vmul.f32 %v570_v9, %v1488_v7  ;;  %v635_v28 = vmul.f32 %v571_v11, %v1488_v7  ;;  %756 = vst [vmem:[%s1790_s30 + $0x98] sm:$0xff] %v692_v20  ;;  %v579_v35 = vld [vmem:[%s1475_s9 + $0x110] sm:$0xff]  ;;  %v580_v36 = vld [vmem:[%s1475_s9 + $0x118] sm:$0xff] }
  0xa4   : > { %757 = vst [vmem:[%s1790_s30 + $0xa0] sm:$0xff] %v693_v21  ;;  %758 = vst [vmem:[%s1790_s30 + $0xa8] sm:$0xff] %v694_v22  ;;  %v636_v30 = vmul.f32 %v572_v12, %v1488_v7  ;;  %v637_v31 = vmul.f32 %v573_v17, %v1488_v7  ;;  %v638_v32 = vmul.f32 %v574_v18, %v1488_v7  ;;  %v581_v41 = vld [vmem:[%s1475_s9 + $0x120] sm:$0xff]  ;;  %v582_v42 = vld [vmem:[%s1475_s9 + $0x128] sm:$0xff] }
  0xa5   : > { %759 = vst [vmem:[%s1790_s30 + $0xb0] sm:$0xff] %v695_v23  ;;  %v639_v33 = vmul.f32 %v575_v19, %v1488_v7  ;;  %760 = vst [vmem:[%s1790_s30 + $0xb8] sm:$0xff] %v696_v25  ;;  %v697_v37 = vadd.f32 %v633_v26, %v1492_v10  ;;  %v698_v38 = vadd.f32 %v634_v27, %v1492_v10  ;;  %v583_v43 = vld [vmem:[%s1475_s9 + $0x130] sm:$0xff]  ;;  %v584_v48 = vld [vmem:[%s1475_s9 + $0x138] sm:$0xff] }
  0xa6   : > { %v699_v39 = vadd.f32 %v635_v28, %v1492_v10  ;;  %v640_v40 = vmul.f32 %v576_v24, %v1488_v7  ;;  %v700_v44 = vadd.f32 %v636_v30, %v1492_v10  ;;  %v701_v45 = vadd.f32 %v637_v31, %v1492_v10  ;;  %v585_v53 = vld [vmem:[%s1475_s9 + $0x140] sm:$0xff]  ;;  %v586_v58 = vld [vmem:[%s1475_s9 + $0x148] sm:$0xff]  ;;  %v587_v59 = vld [vmem:[%s1475_s9 + $0x150] sm:$0xff] }
  0xa7   : > { %v702_v46 = vadd.f32 %v638_v32, %v1492_v10  ;;  %v703_v47 = vadd.f32 %v639_v33, %v1492_v10  ;;  %761 = vst [vmem:[%s1790_s30 + $0xc0] sm:$0xff] %v697_v37  ;;  %762 = vst [vmem:[%s1790_s30 + $0xc8] sm:$0xff] %v698_v38  ;;  %v641_v50 = vmul.f32 %v577_v29, %v1488_v7  ;;  %v588_v60 = vld [vmem:[%s1475_s9 + $0x158] sm:$0xff]  ;;  %v589_v1 = vld [vmem:[%s1475_s9 + $0x160] sm:$0xff] }
  0xa8   : > { %763 = vst [vmem:[%s1790_s30 + $0xd0] sm:$0xff] %v699_v39  ;;  %v704_v49 = vadd.f32 %v640_v40, %v1492_v10  ;;  %v642_v51 = vmul.f32 %v578_v34, %v1488_v7  ;;  %v643_v52 = vmul.f32 %v579_v35, %v1488_v7  ;;  %764 = vst [vmem:[%s1790_s30 + $0xd8] sm:$0xff] %v700_v44  ;;  %v590_v2 = vld [vmem:[%s1475_s9 + $0x168] sm:$0xff]  ;;  %v591_v3 = vld [vmem:[%s1475_s9 + $0x170] sm:$0xff] }
  0xa9   : > { %765 = vst [vmem:[%s1790_s30 + $0xe0] sm:$0xff] %v701_v45  ;;  %766 = vst [vmem:[%s1790_s30 + $0xe8] sm:$0xff] %v702_v46  ;;  %v644_v54 = vmul.f32 %v580_v36, %v1488_v7  ;;  %v645_v55 = vmul.f32 %v581_v41, %v1488_v7  ;;  %v646_v56 = vmul.f32 %v582_v42, %v1488_v7  ;;  %v592_v9 = vld [vmem:[%s1475_s9 + $0x178] sm:$0xff]  ;;  %v593_v15 = vld [vmem:[%s1475_s9 + $0x180] sm:$0xff] }
  0xaa   : > { %767 = vst [vmem:[%s1790_s30 + $0xf0] sm:$0xff] %v703_v47  ;;  %v647_v57 = vmul.f32 %v583_v43, %v1488_v7  ;;  %768 = vst [vmem:[%s1790_s30 + $0xf8] sm:$0xff] %v704_v49  ;;  %v705_v61 = vadd.f32 %v641_v50, %v1492_v10  ;;  %v706_v62 = vadd.f32 %v642_v51, %v1492_v10  ;;  %v594_v20 = vld [vmem:[%s1475_s9 + $0x188] sm:$0xff]  ;;  %v595_v21 = vld [vmem:[%s1475_s9 + $0x190] sm:$0xff] }
  0xab   : > { %v707_v63 = vadd.f32 %v643_v52, %v1492_v10  ;;  %v648_v0 = vmul.f32 %v584_v48, %v1488_v7  ;;  %v708_v4 = vadd.f32 %v644_v54, %v1492_v10  ;;  %v709_v5 = vadd.f32 %v645_v55, %v1492_v10  ;;  %v596_v22 = vld [vmem:[%s1475_s9 + $0x198] sm:$0xff]  ;;  %v597_v27 = vld [vmem:[%s1475_s9 + $0x1a0] sm:$0xff]  ;;  %v598_v28 = vld [vmem:[%s1475_s9 + $0x1a8] sm:$0xff] }
  0xac   : > { %v710_v6 = vadd.f32 %v646_v56, %v1492_v10  ;;  %v711_v8 = vadd.f32 %v647_v57, %v1492_v10  ;;  %769 = vst [vmem:[%s1790_s30 + $0x100] sm:$0xff] %v705_v61  ;;  %770 = vst [vmem:[%s1790_s30 + $0x108] sm:$0xff] %v706_v62  ;;  %v649_v12 = vmul.f32 %v585_v53, %v1488_v7  ;;  %v599_v29 = vld [vmem:[%s1475_s9 + $0x1b0] sm:$0xff]  ;;  %v600_v34 = vld [vmem:[%s1475_s9 + $0x1b8] sm:$0xff] }
  0xad   : > { %771 = vst [vmem:[%s1790_s30 + $0x110] sm:$0xff] %v707_v63  ;;  %v712_v11 = vadd.f32 %v648_v0, %v1492_v10  ;;  %v650_v13 = vmul.f32 %v586_v58, %v1488_v7  ;;  %v651_v14 = vmul.f32 %v587_v59, %v1488_v7  ;;  %772 = vst [vmem:[%s1790_s30 + $0x118] sm:$0xff] %v708_v4  ;;  %v601_v39 = vld [vmem:[%s1475_s9 + $0x1c0] sm:$0xff]  ;;  %v602_v44 = vld [vmem:[%s1475_s9 + $0x1c8] sm:$0xff] }
  0xae   : > { %773 = vst [vmem:[%s1790_s30 + $0x120] sm:$0xff] %v709_v5  ;;  %774 = vst [vmem:[%s1790_s30 + $0x128] sm:$0xff] %v710_v6  ;;  %v652_v16 = vmul.f32 %v588_v60, %v1488_v7  ;;  %v653_v17 = vmul.f32 %v589_v1, %v1488_v7  ;;  %v654_v18 = vmul.f32 %v590_v2, %v1488_v7  ;;  %v603_v45 = vld [vmem:[%s1475_s9 + $0x1d0] sm:$0xff]  ;;  %v604_v46 = vld [vmem:[%s1475_s9 + $0x1d8] sm:$0xff] }
  0xaf   : > { %775 = vst [vmem:[%s1790_s30 + $0x130] sm:$0xff] %v711_v8  ;;  %v655_v19 = vmul.f32 %v591_v3, %v1488_v7  ;;  %776 = vst [vmem:[%s1790_s30 + $0x138] sm:$0xff] %v712_v11  ;;  %v713_v23 = vadd.f32 %v649_v12, %v1492_v10  ;;  %v714_v24 = vadd.f32 %v650_v13, %v1492_v10  ;;  %v605_v51 = vld [vmem:[%s1475_s9 + $0x1e0] sm:$0xff]  ;;  %v606_v52 = vld [vmem:[%s1475_s9 + $0x1e8] sm:$0xff] }
  0xb0   : > { %v715_v25 = vadd.f32 %v651_v14, %v1492_v10  ;;  %v656_v26 = vmul.f32 %v592_v9, %v1488_v7  ;;  %v716_v30 = vadd.f32 %v652_v16, %v1492_v10  ;;  %v717_v31 = vadd.f32 %v653_v17, %v1492_v10  ;;  %v607_v53 = vld [vmem:[%s1475_s9 + $0x1f0] sm:$0xff]  ;;  %v608_v58 = vld [vmem:[%s1475_s9 + $0x1f8] sm:$0xff]  ;;  %s838_s9 = sshll.u32 %s1790_s30, 4  ;;  %s2046_s9 = int_to_ptr.vmem [resolvable:$true] %s838_s9 }
  0xb1   : > { %v718_v32 = vadd.f32 %v654_v18, %v1492_v10  ;;  %v719_v33 = vadd.f32 %v655_v19, %v1492_v10  ;;  %777 = vst [vmem:[%s1790_s30 + $0x140] sm:$0xff] %v713_v23  ;;  %778 = vst [vmem:[%s1790_s30 + $0x148] sm:$0xff] %v714_v24  ;;  %v657_v36 = vmul.f32 %v593_v15, %v1488_v7  ;;  %s1179_s6 = scalar_lea.vmem %s2046_s9, 8192  ;;  %p1186_p4 = scmp.lt.s32.totalorder %s2046_s9, %s1184_s13 }
  0xb2   : > { %779 = vst [vmem:[%s1790_s30 + $0x150] sm:$0xff] %v715_v25  ;;  %v720_v35 = vadd.f32 %v656_v26, %v1492_v10  ;;  %v658_v37 = vmul.f32 %v594_v20, %v1488_v7  ;;  %v659_v38 = vmul.f32 %v595_v21, %v1488_v7  ;;  %780 = vst [vmem:[%s1790_s30 + $0x158] sm:$0xff] %v716_v30  ;;  %p1180_p2 = scmp.ne.s32.totalorder %s2046_s9, %s1179_s6  ;;  %p1187_p8 = scmp.lt.s32.totalorder %s1185_s8, %s1179_s6 }
  0xb3   : > { %781 = vst [vmem:[%s1790_s30 + $0x160] sm:$0xff] %v717_v31  ;;  %782 = vst [vmem:[%s1790_s30 + $0x168] sm:$0xff] %v718_v32  ;;  %v660_v40 = vmul.f32 %v596_v22, %v1488_v7  ;;  %v661_v41 = vmul.f32 %v597_v27, %v1488_v7  ;;  %v662_v42 = vmul.f32 %v598_v28, %v1488_v7 }
  0xb4   : > { %783 = vst [vmem:[%s1790_s30 + $0x170] sm:$0xff] %v719_v33  ;;  %v663_v43 = vmul.f32 %v599_v29, %v1488_v7  ;;  %784 = vst [vmem:[%s1790_s30 + $0x178] sm:$0xff] %v720_v35  ;;  %v721_v47 = vadd.f32 %v657_v36, %v1492_v10  ;;  %v722_v48 = vadd.f32 %v658_v37, %v1492_v10  ;;  %p1181_p0 = pnand %p1180_p2, %p2115_p9  ;;  %p1188_p10 = por %p1187_p8, %p1186_p4 }
  0xb5   : > { %v723_v49 = vadd.f32 %v659_v38, %v1492_v10  ;;  %v664_v50 = vmul.f32 %v600_v34, %v1488_v7  ;;  %v724_v54 = vadd.f32 %v660_v40, %v1492_v10  ;;  %v725_v55 = vadd.f32 %v661_v41, %v1492_v10 }
  0xb6   : > { %v726_v56 = vadd.f32 %v662_v42, %v1492_v10  ;;  %v727_v57 = vadd.f32 %v663_v43, %v1492_v10  ;;  %785 = vst [vmem:[%s1790_s30 + $0x180] sm:$0xff] %v721_v47  ;;  %786 = vst [vmem:[%s1790_s30 + $0x188] sm:$0xff] %v722_v48  ;;  %v665_v60 = vmul.f32 %v601_v39, %v1488_v7  ;;  %p1182_p3 = pneg %p1181_p0 }
  0xb7   : > { %787 = vst [vmem:[%s1790_s30 + $0x190] sm:$0xff] %v723_v49  ;;  %v728_v59 = vadd.f32 %v664_v50, %v1492_v10  ;;  %v666_v61 = vmul.f32 %v602_v44, %v1488_v7  ;;  %v667_v62 = vmul.f32 %v603_v45, %v1488_v7  ;;  %788 = vst [vmem:[%s1790_s30 + $0x198] sm:$0xff] %v724_v54 }
  0xb8   : > { %789 = vst [vmem:[%s1790_s30 + $0x1a0] sm:$0xff] %v725_v55  ;;  %790 = vst [vmem:[%s1790_s30 + $0x1a8] sm:$0xff] %v726_v56  ;;  %v668_v63 = vmul.f32 %v604_v46, %v1488_v7  ;;  %v669_v0 = vmul.f32 %v605_v51, %v1488_v7  ;;  %v670_v1 = vmul.f32 %v606_v52, %v1488_v7  ;;  %p1189_p6 = pnand %p1188_p10, %p1182_p3 }
  0xb9   : > { %791 = vst [vmem:[%s1790_s30 + $0x1b0] sm:$0xff] %v727_v57  ;;  %v671_v2 = vmul.f32 %v607_v53, %v1488_v7  ;;  %792 = vst [vmem:[%s1790_s30 + $0x1b8] sm:$0xff] %v728_v59  ;;  %v729_v3 = vadd.f32 %v665_v60, %v1492_v10  ;;  %v730_v4 = vadd.f32 %v666_v61, %v1492_v10 }
  0xba   : > { %v731_v5 = vadd.f32 %v667_v62, %v1492_v10  ;;  %v672_v6 = vmul.f32 %v608_v58, %v1488_v7  ;;  %v732_v8 = vadd.f32 %v668_v63, %v1492_v10  ;;  %v733_v9 = vadd.f32 %v669_v0, %v1492_v10 }
  0xbb   : > { %v734_v11 = vadd.f32 %v670_v1, %v1492_v10  ;;  %v735_v12 = vadd.f32 %v671_v2, %v1492_v10  ;;  %793 = vst [vmem:[%s1790_s30 + $0x1c0] sm:$0xff] %v729_v3  ;;  %794 = vst [vmem:[%s1790_s30 + $0x1c8] sm:$0xff] %v730_v4 }
  0xbc   : > { %795 = vst [vmem:[%s1790_s30 + $0x1d0] sm:$0xff] %v731_v5  ;;  %v736_v13 = vadd.f32 %v672_v6, %v1492_v10  ;;  %796 = vst [vmem:[%s1790_s30 + $0x1d8] sm:$0xff] %v732_v8 }
  0xbd   : > { %797 = vst [vmem:[%s1790_s30 + $0x1e0] sm:$0xff] %v733_v9  ;;  %798 = vst [vmem:[%s1790_s30 + $0x1e8] sm:$0xff] %v734_v11 }
  0xbe   : > { %799 = vst [vmem:[%s1790_s30 + $0x1f0] sm:$0xff] %v735_v12  ;;  %800 = vst [vmem:[%s1790_s30 + $0x1f8] sm:$0xff] %v736_v13 }
  0xbf   : > { %1192 = shalt.err (!%p1189_p6)
}
  0xc0   : > { %s1193_s30 = scalar_lea.hbm %s2044_s7, 8192  ;;  %s1197_s29 = scalar_lea.hbm %s2099_s4, 16384 }
  0xc1   : > { %p1194_p11 = scmp.ne.s32.totalorder %s2044_s7, %s1193_s30  ;;  %p1198_p12 = scmp.lt.s32.totalorder %s2044_s7, %s2099_s4 }
  0xc2   : > { %p1199_p7 = scmp.lt.s32.totalorder %s1197_s29, %s1193_s30 }
  0xc3   : > { %p1195_p1 = pnand %p1194_p11, %p2115_p9 }
  0xc4   : > { %p1200_p13 = por %p1199_p7, %p1198_p12 }
  0xc5   : > { %p1196_p5 = pneg %p1195_p1 }
  0xc7   : > { %p1201_p2 = pnand %p1200_p13, %p1196_p5 }
  0xc9   : > { %1204 = shalt.err (!%p1201_p2)
}
  0xca   : > { %1024 = dma.vmem_to_hbm [thread:$0]  (%p2115_p9), %s2046_s9, 8192, %s2044_s7, %s807_s14, %s1263_s22, %s1263_s22, %s1264_s11  }
  0xcb PF: > { %s853_s26 = sand.u32 1, %s1243_s15   ;;  %p2116_p0 = scmp.ne.s32.totalorder %s2107_s28, 0 }
  0xcc   : > { %p2117_p3 = scmp.ge.s32.totalorder %s1255_s18, 2  ;;  %s854_s5 = scalar_lea.sflag [#allocation4], %s853_s26 }
  0xce   : > { %p1039_p4 = pnand %p2117_p3, %p2116_p0 }
  0xd0   : > { %p1040_p8 = pneg %p1039_p4 }
  0xd2   : > { %1234 = dma.done.wait (%p1040_p8), %s854_s5, 8192  }
  0xd3   : > { %1236 = vsyncadd (%p1040_p8), %s854_s5, 4294959104  ;;  %s863_s20 = scalar_lea.sflag [#allocation11], %s853_s26 }
  0xd4   : > { %1238 = dma.done.wait (%p1040_p8), %s863_s20, 8192  }
  0xd5   : > { %1240 = vsyncadd (%p1040_p8), %s863_s20, 4294959104  ;;  %p25_p9 = scmp.ge.s32.totalorder %s1316_s21, 4   ;;  %s2118_s15 = smov %s1247_s16 }
  0xd6   : > { %s2119_s16 = smov %s1251_s17  ;;  %s2120_s17 = smov %s1328_s24 }
  0xd7   : > { %s2121_s18 = smov %s1316_s21  ;;  %27 = sbr.rel (!%p25_p9) target bundleno = 12 (0xc), region = 112 }
  0xdc   :  { %868 = vsyncpa [#allocation3], 1 }
  0xdd   :  { %870 = vsyncpa [#allocation3 + $0x1], 1 }
  0xde   :  { %871 = vsyncpa [#allocation8], 1 }
  0xdf   :  { %873 = vsyncpa [#allocation8 + $0x1], 1 }
  0xe0   :  { %874 = vsyncpa [#allocation4], 1 }
  0xe1   :  { %876 = vsyncpa [#allocation4 + $0x1], 1 }
  0xe2   :  { %877 = vsyncpa [#allocation11], 1 }
  0xe3   :  { %879 = vsyncpa [#allocation11 + $0x1], 1 }
  0xe4   :  { %880 = vsyncpa [#allocation5], 1 }
  0xe5   :  { %882 = vsyncpa [#allocation5 + $0x1], 1 }

</bundles_post_ra>
